<compile_context>
chip_gen: v7x
topology: tpu7x:2x2x1
jax: 0.10.0
libtpu: 0.0.40
codegen_flags: <defaults>
</compile_context>

<pallas_src>
import jax
import jax.numpy as jnp
from jax.experimental import pallas as pl
from jax.experimental.pallas import tpu as pltpu


def _round_up(x, m):
    return ((x + m - 1) // m) * m


def _output_head_kernel(x_ref, wv_ref, wp_ref, value_ref, policy_ref):
    # x_ref:      (TB, C, S)  batch tile; S = H*W sits on the 128-lane axis
    # wv_ref:     (C, VP)     value-head linear weight (transposed, lane-padded)
    # wp_ref:     (C, 1)      policy-head 1x1-conv weight (single output channel)
    # value_ref:  (TB, VP)
    # policy_ref: (TB, S)
    x = x_ref[...].astype(jnp.float32)                   # (TB, C, S)
    s = x.shape[2]

    # ---- policy head on the VPU/XLU (C is tiny; keep the MXU off this path) ----
    w = wp_ref[...].astype(jnp.float32)                  # (C, 1)
    weighted = x * w[None, :, :]                         # VALU broadcast over TB, S
    policy_ref[...] = jnp.sum(weighted, axis=1).astype(policy_ref.dtype)   # (TB, S)

    # ---- value head: spatial mean (XLU lane reduce) + one (TB,C)@(C,VP) matmul ----
    means = jnp.sum(x, axis=2) * (1.0 / s)               # (TB, C) f32
    value_ref[...] = jnp.dot(
        means, wv_ref[...].astype(jnp.float32), preferred_element_type=jnp.float32
    ).astype(value_ref.dtype)                            # (TB, VP)


def _pick_tile_and_vmem(B, C, S, VP, itemsize):
    """Pick the batch tile TB and vmem limit from the per-core VMEM size."""
    try:
        vmem_cap = int(pltpu.get_tpu_info().vmem_capacity_bytes)
    except Exception:
        vmem_cap = 64 << 20                               # conservative: v7x per-TC VMEM
    budget = min(vmem_cap // 2, 48 << 20)                 # working-set target
    vmem_limit = int(min(vmem_cap, budget + (16 << 20)))

    c_pad = _round_up(C, 8)                                # sublane padding of (C, S) tiles
    s_pad = _round_up(S, 128)                              # lane padding
    # bytes resident per batch row per grid step: double-buffered input block
    # + double-buffered policy / value output blocks.
    per_row = itemsize * (2 * c_pad * s_pad + 2 * s_pad + 2 * VP)
    tb = max(8, (budget // max(per_row, 1)) // 8 * 8)

    if B <= tb:
        # Single grid step; block dims == array dims, so no batch padding needed.
        return B, vmem_limit

    # Multi-step: TB must stay a multiple of 8 (dense sublane output stores).
    # Balance steps so the (possibly partial, masked) last tile is not tiny and
    # v7x can shard the parallel batch axis across its two TensorCores.
    steps = pl.cdiv(B, tb)
    tb = min(tb, _round_up(pl.cdiv(B, steps), 8))
    return tb, vmem_limit


def output_head_v0(feature, value_weight, policy_weight):
    """Pallas TPU forward of OutputHeadV0.

    feature:       (B, C, H, W)
    value_weight:  (V, C)       -- nn.Linear(dim_feature, dim_value, bias=False).weight
    policy_weight: (1, C, 1, 1) -- nn.Conv2d(dim_feature, 1, ks=1, bias=False).weight
    Returns (value: (B, V), policy: (B, H, W)) matching OutputHeadV0.forward.
    """
    B, C, H, W = feature.shape
    S = H * W
    V = value_weight.shape[0]
    dt = feature.dtype

    # Lane-pad the value head so its output stores are 128-lane dense; slice after.
    VP = _round_up(max(V, 1), 128)
    wv = jnp.zeros((C, VP), dt).at[:, :V].set(value_weight.T.astype(dt))   # (C, VP)
    wp = policy_weight.reshape(C, 1).astype(dt)                            # (C, 1)

    itemsize = max(2, jnp.dtype(dt).itemsize)
    TB, vmem_limit = _pick_tile_and_vmem(B, C, S, VP, itemsize)

    # NCHW -> (B, C, S): free reshape, the spatial axis lands on the 128-lane dim.
    # TODO(synk): for tiny C (4 here) the (C, S) tiles pad C->8 sublanes; packing
    # batch into the sublane axis ((B*C, S) blocks) would halve VMEM per tile, but
    # the kernel is HBM-bound so it does not change the roofline.
    x = feature.reshape(B, C, S)

    value_p, policy2 = pl.pallas_call(
        _output_head_kernel,
        out_shape=(
            jax.ShapeDtypeStruct((B, VP), dt),
            jax.ShapeDtypeStruct((B, S), dt),
        ),
        grid_spec=pltpu.PrefetchScalarGridSpec(
            num_scalar_prefetch=0,
            grid=(pl.cdiv(B, TB),),
            in_specs=[
                pl.BlockSpec((TB, C, S), lambda b: (b, 0, 0)),   # batch tile of features
                pl.BlockSpec((C, VP), lambda b: (0, 0)),         # value weight (resident)
                pl.BlockSpec((C, 1), lambda b: (0, 0)),          # policy weight (resident)
            ],
            out_specs=[
                pl.BlockSpec((TB, VP), lambda b: (b, 0)),        # lane-dense value slab
                pl.BlockSpec((TB, S), lambda b: (b, 0)),         # sublane/lane-dense policy
            ],
        ),
        compiler_params=pltpu.CompilerParams(
            dimension_semantics=("parallel",),
            vmem_limit_bytes=vmem_limit,
        ),
    )(x, wv, wp)

    value = value_p[:, :V]
    policy = policy2.reshape(B, H, W)   # == torch.squeeze(policy, dim=1)
    return value, policy


if __name__ == "__main__":
    B, C, H, W = 2, 4, 16, 16
    DIM_VALUE = 3

    key = jax.random.PRNGKey(0)
    k1, k2, k3 = jax.random.split(key, 3)
    feature = jax.random.normal(k1, (B, C, H, W), dtype=jnp.float32)
    # nn.Linear(dim_feature, dim_value, bias=False).weight -> (V, C)
    value_weight = 0.1 * jax.random.normal(k2, (DIM_VALUE, C), dtype=jnp.float32)
    # nn.Conv2d(dim_feature, 1, kernel_size=1, bias=False).weight -> (1, C, 1, 1)
    policy_weight = 0.1 * jax.random.normal(k3, (1, C, 1, 1), dtype=jnp.float32)

    value, policy = output_head_v0(feature, value_weight, policy_weight)
    jax.block_until_ready((value, policy))

    # pure-JAX reference
    mean_ref = jnp.mean(feature, axis=(2, 3))                                  # (B, C)
    value_ref = mean_ref @ value_weight.T                                      # (B, V)
    policy_ref = jnp.einsum("oc,bchw->bohw", policy_weight[:, :, 0, 0], feature)[:, 0]

    assert value.shape == (B, DIM_VALUE) and policy.shape == (B, H, W)
    assert jnp.allclose(value, value_ref, atol=1e-5, rtol=1e-5)
    assert jnp.allclose(policy, policy_ref, atol=1e-5, rtol=1e-5)

    print("KERNEL_OK")
</pallas_src>

<mosaic_0001>
module attributes {stable_mosaic.version = 11 : i64} {
  func.func @_output_head_kernel(%arg0: i32, %arg1: memref<2x4x256xf32, #tpu.memory_space<vmem>>, %arg2: memref<4x128xf32, #tpu.memory_space<vmem>>, %arg3: memref<4x1xf32, #tpu.memory_space<vmem>>, %arg4: memref<2x128xf32, #tpu.memory_space<vmem>>, %arg5: memref<2x256xf32, #tpu.memory_space<vmem>>) attributes {dimension_semantics = [#tpu.dimension_semantics<parallel>], iteration_bounds = array<i64: 1>, scalar_prefetch = 0 : i64, scratch_operands = 0 : i64, tpu.core_type = #tpu.core_type<tc>, window_params = [{transform_indices = @transform_0, window_bounds = array<i64: 2, 4, 256>}, {pipeline_mode = #tpu.pipeline_mode<synchronous>, transform_indices = @transform_1, window_bounds = array<i64: 4, 128>}, {pipeline_mode = #tpu.pipeline_mode<synchronous>, transform_indices = @transform_2, window_bounds = array<i64: 4, 1>}, {transform_indices = @transform_3, window_bounds = array<i64: 2, 128>}, {transform_indices = @transform_4, window_bounds = array<i64: 2, 256>}]} {
    %c0 = arith.constant 0 : index
    %c0_0 = arith.constant 0 : index
    %c0_1 = arith.constant 0 : index
    %0 = vector.load %arg1[%c0, %c0_0, %c0_1] : memref<2x4x256xf32, #tpu.memory_space<vmem>>, vector<2x4x256xf32>
    %c0_2 = arith.constant 0 : index
    %c0_3 = arith.constant 0 : index
    %1 = vector.load %arg3[%c0_2, %c0_3] : memref<4x1xf32, #tpu.memory_space<vmem>>, vector<4x1xf32>
    %2 = vector.shape_cast %1 : vector<4x1xf32> to vector<1x4x1xf32>
    %3 = vector.broadcast %2 : vector<1x4x1xf32> to vector<2x4x256xf32>
    %4 = arith.mulf %0, %3 : vector<2x4x256xf32>
    %cst = arith.constant dense<0.000000e+00> : vector<2x256xf32>
    %5 = vector.multi_reduction <add>, %4, %cst [1] : vector<2x4x256xf32> to vector<2x256xf32>
    %c0_4 = arith.constant 0 : index
    %c0_5 = arith.constant 0 : index
    %6 = vector.load %arg5[%c0_4, %c0_5] : memref<2x256xf32, #tpu.memory_space<vmem>>, vector<2x256xf32>
    tpu.vector_store %arg5[%c0_4, %c0_5], %5 {strides = array<i32>} : memref<2x256xf32, #tpu.memory_space<vmem>>, vector<2x256xf32>,
    %cst_6 = arith.constant dense<0.000000e+00> : vector<2x4xf32>
    %7 = vector.multi_reduction <add>, %0, %cst_6 [2] : vector<2x4x256xf32> to vector<2x4xf32>
    %cst_7 = arith.constant 3.906250e-03 : f32
    %8 = vector.broadcast %cst_7 : f32 to vector<2x4xf32>
    %9 = arith.mulf %7, %8 : vector<2x4xf32>
    %c0_8 = arith.constant 0 : index
    %c0_9 = arith.constant 0 : index
    %10 = vector.load %arg2[%c0_8, %c0_9] : memref<4x128xf32, #tpu.memory_space<vmem>>, vector<4x128xf32>
    %cst_10 = arith.constant dense<0.000000e+00> : vector<2x128xf32>
    %11 = tpu.matmul %9, %10, %cst_10 {dimension_numbers = #tpu.dot_dimension_numbers<[1], [0], [0], [1], [0, 0, 1, 1], [], []>} : vector<2x4xf32>, vector<4x128xf32>, vector<2x128xf32> -> vector<2x128xf32>
    %c0_11 = arith.constant 0 : index
    %c0_12 = arith.constant 0 : index
    %12 = vector.load %arg4[%c0_11, %c0_12] : memref<2x128xf32, #tpu.memory_space<vmem>>, vector<2x128xf32>
    tpu.vector_store %arg4[%c0_11, %c0_12], %11 {strides = array<i32>} : memref<2x128xf32, #tpu.memory_space<vmem>>, vector<2x128xf32>,
    return
  }
  func.func @transform_0(%arg0: i32) -> (i32, i32, i32) {
    %c0_i32 = arith.constant 0 : i32
    %c0_i32_0 = arith.constant 0 : i32
    %c0_i32_1 = arith.constant 0 : i32
    return %arg0, %c0_i32, %c0_i32_0 : i32, i32, i32
  }
  func.func @transform_1(%arg0: i32) -> (i32, i32) {
    %c0_i32 = arith.constant 0 : i32
    %c0_i32_0 = arith.constant 0 : i32
    %c0_i32_1 = arith.constant 0 : i32
    return %c0_i32, %c0_i32_0 : i32, i32
  }
  func.func @transform_2(%arg0: i32) -> (i32, i32) {
    %c0_i32 = arith.constant 0 : i32
    %c0_i32_0 = arith.constant 0 : i32
    %c0_i32_1 = arith.constant 0 : i32
    return %c0_i32, %c0_i32_0 : i32, i32
  }
  func.func @transform_3(%arg0: i32) -> (i32, i32) {
    %c0_i32 = arith.constant 0 : i32
    %c0_i32_0 = arith.constant 0 : i32
    return %arg0, %c0_i32 : i32, i32
  }
  func.func @transform_4(%arg0: i32) -> (i32, i32) {
    %c0_i32 = arith.constant 0 : i32
    %c0_i32_0 = arith.constant 0 : i32
    return %arg0, %c0_i32 : i32, i32
  }
}

</mosaic_0001>

<bundles_post_ra>
// kernel: tpu_custom_call.1
= control target key start
LH: loop header
LB: loop body
LE: loop exit
PB: predicated region body
PF: predicated region fallthrough
CT: control target
= control target key end

     0   :  { %10 = vsyncpa [#allocation3], 0  ;;  %s440_s0 = inlined_call_operand.hbm [shape: f32[2,4,256], index: 0, kind: input, shape index: {}]   ;;  %s441_s1 = inlined_call_operand.vmem [shape: f32[4,128], index: 1, kind: input, shape index: {}]   ;;  %s442_s2 = inlined_call_operand.vmem [shape: f32[4,1], index: 2, kind: input, shape index: {}]   ;;  %s443_s3 = inlined_call_operand.hbm [shape: f32[2,128], index: 3, kind: output, shape index: {0}]   ;;  %s444_s4 = inlined_call_operand.hbm [shape: f32[2,256], index: 4, kind: output, shape index: {1}]  }
   0x1   :  { %11 = vsyncpa [#allocation4], 0 }
   0x2   :  { %12 = vsyncpa [#allocation7], 0  ;;  %s352_s15 = smov [#allocation2]   ;;  %s280_s19 = scalar_lea.hbm %s440_s0, 256 }
   0x3   :  { %s18_s16 = sshll.u32 %s352_s15, 4  ;;  %p281_p0 = scmp.ne.s32.totalorder %s440_s0, %s280_s19  ;;  %s19_s16 = int_to_ptr.vmem [resolvable:$true] %s18_s16 }
   0x4   :  { %p284_p1 = scmp.lt.u32.totalorder %s280_s19, %s440_s0 }
   0x6   :  { %p286_p2 = pnand %p284_p1, %p281_p0 }
   0x8   :  { %289 = shalt.err (!%p286_p2)
}
   0x9   :  { %s290_s24 = scalar_lea.vmem %s19_s16, 256  ;;  %p295_p4 = scmp.lt.s32.totalorder %s19_s16, %s19_s16 }
   0xa   :  { %p291_p3 = scmp.ne.s32.totalorder %s19_s16, %s290_s24  ;;  %p296_p5 = scmp.lt.s32.totalorder %s290_s24, %s290_s24 }
   0xc   :  { %p297_p6 = por %p296_p5, %p295_p4 }
   0xe   :  { %p298_p7 = pnand %p297_p6, %p291_p3 }
  0x10   :  { %301 = shalt.err (!%p298_p7)
}
  0x11   :  { %s353_s25 = smov 128   ;;  %s354_s26 = smov 8  }
  0x12   :  { %24 = dma.hbm_to_vmem [thread:$0]  %s440_s0, 256, %s19_s16, [#allocation3], %s353_s25, %s353_s25, %s354_s26  }
  0x13   :  { %346 = dma.done.wait [#allocation3], 256  }
  0x14   :  { %347 = vsyncadd [#allocation3], 4294967040  ;;  %vm55_vm0 = vcmask 1043456   ;;  %v32_v0 = vld [vmem:[#allocation2] sm:$0xff]  ;;  %v33_v1 = vld [vmem:[#allocation2 + $0x8] sm:$0xff]  ;;  %v355_v11 = vmov 0.0   ;;  %v42_v14 = vlaneseq }
  0x15   :  { %v121_v2 = vcombine.high %v32_v0, %v32_v0  ;;  %v125_v3 = vsel %vm55_vm0, %v32_v0, 0.0  ;;  %v122_v4 = vcombine.high %v33_v1, %v33_v1  ;;  %v130_v6 = vsel %vm55_vm0, %v33_v1, 0.0  ;;  %v137_v10 = vld [vmem:[%s441_s1] sm:$0xf]  ;;  %261 = vmatprep.subr.mxu0 %v355_v11  ;;  %s360_s1 = smov [#allocation6]  }
  0x16   :  { %vm356_vm1 = vmmov 0   ;;  %262 = vmatpush3.msk.msra.mxu0 %vm55_vm0, %v137_v10  ;;  %v34_v12 = vld [vmem:[%s442_s2] sm:$0xf]  ;;  %v357_v13 = vmov 0   ;;  %v43_v15 = vshrl.u32 %v42_v14, 7  ;;  %v141_v16 = vand.u32 127, %v42_v14 }
  0x17   :  { %v126_v5 = vsel %vm55_vm0, %v121_v2, 0.0  ;;  %v131_v7 = vsel %vm55_vm0, %v122_v4, 0.0  ;;  %263 = vmatprep.mubr.msk.f32.mxu0 %vm356_vm1, %v355_v11  ;;  %276 = vset.pattern.permute.xlu1 %v357_v13  ;;  %vm109_vm2 = vcmask 1041409   ;;  %vm151_vm3 = vcmask 31744   ;;  %s244_s2 = sshll.u32 %s360_s1, 4  ;;  %s245_s2 = int_to_ptr.vmem [resolvable:$true] %s244_s2 }
  0x18   :  { %v127_v8 = vadd.f32 %v126_v5, %v125_v3  ;;  %v132_v9 = vadd.f32 %v131_v7, %v130_v6  ;;  %277 = vset.pattern.permute.xlu0 %v357_v13  ;;  %37 = vperm.xlu1 %276, %v34_v12   ;;  %v144_v18 = vsub.s32 %v141_v16, %v43_v15  ;;  %v358_v25 = vmov 839922192   ;;  %s302_s6 = scalar_lea.vmem %s245_s2, 64  ;;  %p307_p9 = scmp.lt.s32.totalorder %s245_s2, %s245_s2 }
  0x19   :  { %v40_v26 = vunpack.c.l.s4 %v358_v25  ;;  %v359_v63 = vmov 1983009808   ;;  %vm111_vm4 = vcmask 1043459   ;;  %vm113_vm5 = vcmask 1045509   ;;  %p303_p8 = scmp.ne.s32.totalorder %s245_s2, %s302_s6  ;;  %p308_p10 = scmp.lt.s32.totalorder %s302_s6, %s302_s6 }
  0x1a   :  { %128 = vadd.xlane.f32.xlu0 %v127_v8  ;;  %vm115_vm6 = vcmask 1047559  }
  0x1b   :  { %v41_v27 = vunpack.c.0.s8 %v40_v26  ;;  %p309_p11 = por %p308_p10, %p307_p9 }
  0x1d   :  { %v44_v28 = vsub.s32 %v41_v27, %v43_v15  ;;  %p310_p12 = pnand %p309_p11, %p303_p8 }
  0x1e   :  { %133 = vadd.xlane.f32.xlu0 %v132_v9 }
  0x97   :  { %v38_v29 = vpop.permute.xlu1 %37 }
  0x98   :  { %v45_v30 = vrot.slane %v38_v29, %v44_v28 }
  0x9a   :  { %v48_v31 = vmul.f32 %v45_v30, %v33_v1  ;;  %v47_v32 = vmul.f32 %v45_v30, %v32_v0  ;;  %v90_v0 = vunpack.c.l.s4 %v359_v63 }
  0x9c   :  { %v52_v33 = vcombine.high %v48_v31, %v48_v31  ;;  %v51_v34 = vcombine.high %v47_v32, %v47_v32  ;;  %v70_v35 = vsel %vm55_vm0, %v48_v31, 0.0  ;;  %v56_v37 = vsel %vm55_vm0, %v47_v32, 0.0 }
  0x9d   :  { %v71_v39 = vrot.slane %v70_v35, 4  ;;  %v57_v41 = vrot.slane %v56_v37, 4  ;;  %v91_v2 = vunpack.c.0.s8 %v90_v0 }
  0x9e   :  { %v77_v36 = vsel %vm55_vm0, %v52_v33, 0.0  ;;  %v63_v38 = vsel %vm55_vm0, %v51_v34, 0.0 }
  0x9f   :  { %v78_v40 = vrot.slane %v77_v36, 4  ;;  %v64_v42 = vrot.slane %v63_v38, 4  ;;  %v72_v43 = vadd.f32 %v71_v39, %v70_v35  ;;  %v58_v45 = vadd.f32 %v57_v41, %v56_v37 }
  0xa0   :  { %v94_v4 = vsub.s32 %v91_v2, %v43_v15 }
  0xa1   :  { %v79_v44 = vadd.f32 %v78_v40, %v77_v36  ;;  %v65_v46 = vadd.f32 %v64_v42, %v63_v38  ;;  %v73_v47 = vrot.slane %v72_v43, 2  ;;  %v59_v49 = vrot.slane %v58_v45, 2 }
  0xa3   :  { %v80_v48 = vrot.slane %v79_v44, 2  ;;  %v66_v50 = vrot.slane %v65_v46, 2  ;;  %v74_v51 = vadd.f32 %v73_v47, %v72_v43  ;;  %v60_v53 = vadd.f32 %v59_v49, %v58_v45 }
  0xa5   :  { %v81_v52 = vadd.f32 %v80_v48, %v79_v44  ;;  %v67_v54 = vadd.f32 %v66_v50, %v65_v46  ;;  %v75_v55 = vrot.slane %v74_v51, 1  ;;  %v61_v57 = vrot.slane %v60_v53, 1 }
  0xa7   :  { %v129_v17 = vpop.xlane.xlu0 %128  ;;  %v82_v56 = vrot.slane %v81_v52, 1  ;;  %v68_v58 = vrot.slane %v67_v54, 1  ;;  %v76_v59 = vadd.f32 %v75_v55, %v74_v51  ;;  %v62_v61 = vadd.f32 %v61_v57, %v60_v53 }
  0xa8   :  { %v135_v19 = vmul.f32 0.00390625, %v129_v17 }
  0xa9   :  { %v83_v60 = vadd.f32 %v82_v56, %v81_v52  ;;  %v69_v62 = vadd.f32 %v68_v58, %v67_v54 }
  0xaa   :  { %v145_v22 = vrot.slane %v135_v19, %v144_v18 }
  0xab   :  { %v134_v20 = vpop.xlane.xlu0 %133  ;;  %v96_v1 = vcombine.low %v76_v59, %v83_v60  ;;  %v88_v3 = vcombine.low %v62_v61, %v69_v62 }
  0xac   :  { %v136_v21 = vmul.f32 0.00390625, %v134_v20 }
  0xad   :  { %v103_v5 = vrot.slane %v96_v1, %v94_v4  ;;  %v95_v6 = vrot.slane %v88_v3, %v94_v4 }
  0xae   :  { %v149_v23 = vrot.slane %v136_v21, %v144_v18 }
  0xaf   :  { %v108_v7 = vrot.slane %v103_v5, 7 }
  0xb0   :  { %v150_v24 = vsel %vm109_vm2, %v149_v23, %v145_v22 }
  0xb1   :  { %264 = vmatmul.mubr.msk.f32.vlgmr.msra.gmra.mrb[0].mxu0 %vm151_vm3, %v150_v24  ;;  %v110_v8 = vsel %vm109_vm2, %v108_v7, %v95_v6 }
  0xb2   :  { %v112_v9 = vsel %vm111_vm4, %v108_v7, %v110_v8 }
  0xb3   :  { %v114_v10 = vsel %vm113_vm5, %v108_v7, %v112_v9 }
  0xb4   :  { %v116_v11 = vsel %vm115_vm6, %v108_v7, %v114_v10 }
  0xb5   :  { %118 = vst [vmem:[#allocation6] sm:$0xf] %v116_v11 }
  0xb6   :  { %313 = shalt.err (!%p310_p12)
}
  0xb7   :  { %s314_s9 = scalar_lea.hbm %s444_s4, 64 }
  0xb8   :  { %p315_p13 = scmp.ne.s32.totalorder %s444_s4, %s314_s9  ;;  %p318_p0 = scmp.lt.u32.totalorder %s314_s9, %s444_s4 }
  0xba   :  { %p320_p1 = pnand %p318_p0, %p315_p13 }
  0xbc   :  { %323 = shalt.err (!%p320_p1)
}
  0xbd   :  { %247 = dma.vmem_to_hbm [thread:$0]  %s245_s2, 64, %s444_s4, [#allocation7]  }
  0xbe   :  { %s361_s16 = smov [#allocation5]  }
  0xbf   :  { %s234_s17 = sshll.u32 %s361_s16, 4  ;;  %s235_s17 = int_to_ptr.vmem [resolvable:$true] %s234_s17 }
  0xc0   :  { %s324_s18 = scalar_lea.vmem %s235_s17, 32  ;;  %p329_p3 = scmp.lt.s32.totalorder %s235_s17, %s235_s17 }
  0xc1   :  { %p325_p2 = scmp.ne.s32.totalorder %s235_s17, %s324_s18  ;;  %p330_p4 = scmp.lt.s32.totalorder %s324_s18, %s324_s18 }
  0xc3   :  { %p331_p5 = por %p330_p4, %p329_p3 }
  0xc5   :  { %p332_p6 = pnand %p331_p5, %p325_p2 }
 0x184   :  { %v223_v12 = vpop.f32.mrb[0].mxu0 }
 0x185   :  { %227 = vst [vmem:[#allocation5] sm:$0x3] %v223_v12  ;;  %v265_v13 = vpop.f32.mrb[1].mxu0 }
 0x186   :  { %335 = shalt.err (!%p332_p6)
}
 0x187   :  { %s336_s21 = scalar_lea.hbm %s443_s3, 32 }
 0x188   :  { %p337_p7 = scmp.ne.s32.totalorder %s443_s3, %s336_s21  ;;  %p340_p8 = scmp.lt.u32.totalorder %s336_s21, %s443_s3 }
 0x18a   :  { %p342_p9 = pnand %p340_p8, %p337_p7 }
 0x18c   :  { %345 = shalt.err (!%p342_p9)
}
 0x18d   :  { %237 = dma.vmem_to_hbm [thread:$0]  %s235_s17, 32, %s443_s3, [#allocation4]  }
 0x18e   :  { %348 = dma.done.wait [#allocation4], 32  }
 0x18f   :  { %349 = vsyncadd [#allocation4], 4294967264 }
 0x190   :  { %350 = dma.done.wait [#allocation7], 64  }
 0x191   :  { %351 = vsyncadd [#allocation7], 4294967232 }
 0x192   :  { %254 = vsyncpa [#allocation3], 1 }
 0x193   :  { %255 = vsyncpa [#allocation4], 1 }
 0x194   :  { %256 = vsyncpa [#allocation7], 1 }

</bundles_post_ra>
